<compile_context>
chip_gen: v7x
topology: tpu7x:2x2x1
jax: 0.10.0
libtpu: 0.0.40
codegen_flags: <defaults>
</compile_context>

<pallas_src>
import jax
import jax.numpy as jnp
from jax.experimental import pallas as pl
from jax.experimental.pallas import tpu as pltpu

NUM_CLASS = 10  # MNIST NumClass global from the reference code


def _round_up(v, m):
    return ((v + m - 1) // m) * m


def _ebem_loss_kernel(xt_ref, pt_ref, o_ref):
    # xt_ref / pt_ref: (C, TN) class-major blocks (classes on the sublane axis,
    # samples lane-dense).  o_ref: (1, 8, 128) per-block partial-sum slab.
    x = xt_ref[...].astype(jnp.float32)
    p = pt_ref[...].astype(jnp.float32)

    # Numerically stable logsumexp over the class (sublane) axis.
    m = jnp.max(x, axis=0, keepdims=True)                        # (1, TN)
    xm = x - m
    lse = jnp.log(jnp.sum(jnp.exp(xm), axis=0, keepdims=True))   # (1, TN), relative to m

    # Weighted CE per sample, fused into a single class-axis reduction:
    #   sum_k p[k] * ((m + lse) - x[k]) = sum_k p[k] * (lse - (x[k] - m))
    per_sample = jnp.sum(p * (lse - xm), axis=0, keepdims=True)  # (1, TN)

    # Per-block partial sum.  Division by the *global* N happens once in the
    # wrapper, so partial tiles (zero-padded samples with P == 0) are exact.
    partial = jnp.sum(per_sample, axis=1, keepdims=True)         # (1, 1)
    o_ref[...] = jnp.broadcast_to(partial, (1, 8, 128))


def ebem_loss(x, p_matrix, *, block_n=16384):
    """EBEMLoss forward.  x: [N, C] logits, p_matrix: [N, C] weights -> scalar."""
    n, c = x.shape
    assert p_matrix.shape == (n, c)

    # Lane-dense layout: samples on the 128-wide lane axis, classes on sublanes.
    tn = min(block_n, _round_up(n, 128))
    n_pad = _round_up(n, tn)
    pad = n_pad - n
    # Zero padding is exact: padded samples have P == 0 -> zero contribution.
    xt = jnp.pad(x, ((0, pad), (0, 0))).T          # (C, n_pad)
    pt = jnp.pad(p_matrix, ((0, pad), (0, 0))).T   # (C, n_pad)
    num_blocks = n_pad // tn

    partials = pl.pallas_call(
        _ebem_loss_kernel,
        out_shape=jax.ShapeDtypeStruct((num_blocks, 8, 128), jnp.float32),
        grid_spec=pl.GridSpec(
            grid=(num_blocks,),
            in_specs=[
                pl.BlockSpec((c, tn), lambda i: (0, i)),
                pl.BlockSpec((c, tn), lambda i: (0, i)),
            ],
            out_specs=pl.BlockSpec((1, 8, 128), lambda i: (i, 0, 0)),
        ),
        compiler_params=pltpu.CompilerParams(
            dimension_semantics=("parallel",),
        ),
    )(xt, pt)

    # Finish the tiny cross-block reduction in JAX; divide once by the TRUE N.
    return jnp.sum(partials[:, 0, 0]) / jnp.float32(n)


def _ebem_loss_ref(x, p_matrix):
    # Pure-JAX reference mirroring the PyTorch per-class CE loop (vectorized).
    n = x.shape[0]
    log_probs = jax.nn.log_softmax(x.astype(jnp.float32), axis=-1)
    return jnp.sum(p_matrix.astype(jnp.float32) * (-log_probs)) / n


if __name__ == "__main__":
    key = jax.random.PRNGKey(0)
    k1, k2, k3, k4 = jax.random.split(key, 4)

    # Small MNIST-like test: N=8 samples, 10 classes, single block.
    N1 = 8
    x1 = jax.random.normal(k1, (N1, NUM_CLASS), dtype=jnp.float32)
    p1 = jax.nn.softmax(jax.random.normal(k2, (N1, NUM_CLASS), dtype=jnp.float32), axis=-1)
    out1 = ebem_loss(x1, p1)
    jax.block_until_ready(out1)
    ref1 = _ebem_loss_ref(x1, p1)
    assert jnp.allclose(out1, ref1, rtol=1e-5, atol=1e-5), (out1, ref1)

    # Multi-block + ragged-N test to exercise tiling and zero-padding
    # (N=2000, block_n=256 -> n_pad=2048, 8 grid steps).
    N2 = 2000
    x2 = jax.random.normal(k3, (N2, NUM_CLASS), dtype=jnp.float32)
    p2 = jax.nn.softmax(jax.random.normal(k4, (N2, NUM_CLASS), dtype=jnp.float32), axis=-1)
    out2 = ebem_loss(x2, p2, block_n=256)
    jax.block_until_ready(out2)
    ref2 = _ebem_loss_ref(x2, p2)
    assert jnp.allclose(out2, ref2, rtol=1e-4, atol=1e-4), (out2, ref2)

    # Narrow-dtype inputs (bf16 in HBM, f32 compute inside the kernel).
    out3 = ebem_loss(x2.astype(jnp.bfloat16), p2.astype(jnp.bfloat16), block_n=256)
    jax.block_until_ready(out3)
    ref3 = _ebem_loss_ref(x2.astype(jnp.bfloat16), p2.astype(jnp.bfloat16))
    assert jnp.allclose(out3, ref3, rtol=1e-3, atol=1e-3), (out3, ref3)

    print("KERNEL_OK")
</pallas_src>

<mosaic_0001>
module attributes {stable_mosaic.version = 11 : i64} {
  func.func @_ebem_loss_kernel(%arg0: i32, %arg1: memref<10x128xf32, #tpu.memory_space<vmem>>, %arg2: memref<10x128xf32, #tpu.memory_space<vmem>>, %arg3: memref<1x8x128xf32, #tpu.memory_space<vmem>>) attributes {dimension_semantics = [#tpu.dimension_semantics<parallel>], iteration_bounds = array<i64: 1>, scalar_prefetch = 0 : i64, scratch_operands = 0 : i64, tpu.core_type = #tpu.core_type<tc>, window_params = [{transform_indices = @transform_0, window_bounds = array<i64: 10, 128>}, {transform_indices = @transform_1, window_bounds = array<i64: 10, 128>}, {transform_indices = @transform_2, window_bounds = array<i64: 1, 8, 128>}]} {
    %c0 = arith.constant 0 : index
    %c0_0 = arith.constant 0 : index
    %0 = vector.load %arg1[%c0, %c0_0] : memref<10x128xf32, #tpu.memory_space<vmem>>, vector<10x128xf32>
    %c0_1 = arith.constant 0 : index
    %c0_2 = arith.constant 0 : index
    %1 = vector.load %arg2[%c0_1, %c0_2] : memref<10x128xf32, #tpu.memory_space<vmem>>, vector<10x128xf32>
    %cst = arith.constant dense<0xFF800000> : vector<128xf32>
    %2 = vector.multi_reduction <maximumf>, %0, %cst [0] : vector<10x128xf32> to vector<128xf32>
    %3 = vector.shape_cast %2 : vector<128xf32> to vector<1x128xf32>
    %4 = vector.broadcast %3 : vector<1x128xf32> to vector<10x128xf32>
    %5 = arith.subf %0, %4 : vector<10x128xf32>
    %6 = math.exp %5 : vector<10x128xf32>
    %cst_3 = arith.constant dense<0.000000e+00> : vector<128xf32>
    %7 = vector.multi_reduction <add>, %6, %cst_3 [0] : vector<10x128xf32> to vector<128xf32>
    %8 = vector.shape_cast %7 : vector<128xf32> to vector<1x128xf32>
    %9 = math.log %8 : vector<1x128xf32>
    %10 = vector.broadcast %9 : vector<1x128xf32> to vector<10x128xf32>
    %11 = arith.subf %10, %5 : vector<10x128xf32>
    %12 = arith.mulf %1, %11 : vector<10x128xf32>
    %cst_4 = arith.constant dense<0.000000e+00> : vector<128xf32>
    %13 = vector.multi_reduction <add>, %12, %cst_4 [0] : vector<10x128xf32> to vector<128xf32>
    %14 = vector.shape_cast %13 : vector<128xf32> to vector<1x128xf32>
    %cst_5 = arith.constant dense<0.000000e+00> : vector<1xf32>
    %15 = vector.multi_reduction <add>, %14, %cst_5 [1] : vector<1x128xf32> to vector<1xf32>
    %16 = vector.shape_cast %15 : vector<1xf32> to vector<1x1xf32>
    %17 = vector.shape_cast %16 : vector<1x1xf32> to vector<1x1x1xf32>
    %18 = vector.broadcast %17 : vector<1x1x1xf32> to vector<1x8x128xf32>
    %c0_6 = arith.constant 0 : index
    %c0_7 = arith.constant 0 : index
    %c0_8 = arith.constant 0 : index
    %19 = vector.load %arg3[%c0_6, %c0_7, %c0_8] : memref<1x8x128xf32, #tpu.memory_space<vmem>>, vector<1x8x128xf32>
    tpu.vector_store %arg3[%c0_6, %c0_7, %c0_8], %18 {strides = array<i32>} : memref<1x8x128xf32, #tpu.memory_space<vmem>>, vector<1x8x128xf32>,
    return
  }
  func.func @transform_0(%arg0: i32) -> (i32, i32) {
    %c0_i32 = arith.constant 0 : i32
    %c0_i32_0 = arith.constant 0 : i32
    return %c0_i32, %arg0 : i32, i32
  }
  func.func @transform_1(%arg0: i32) -> (i32, i32) {
    %c0_i32 = arith.constant 0 : i32
    %c0_i32_0 = arith.constant 0 : i32
    return %c0_i32, %arg0 : i32, i32
  }
  func.func @transform_2(%arg0: i32) -> (i32, i32, i32) {
    %c0_i32 = arith.constant 0 : i32
    %c0_i32_0 = arith.constant 0 : i32
    %c0_i32_1 = arith.constant 0 : i32
    return %arg0, %c0_i32, %c0_i32_0 : i32, i32, i32
  }
}

</mosaic_0001>

<bundles_post_ra>
// kernel: tpu_custom_call.1
= control target key start
LH: loop header
LB: loop body
LE: loop exit
PB: predicated region body
PF: predicated region fallthrough
CT: control target
= control target key end

     0   :  { %7 = vsyncpa [#allocation3], 0  ;;  %s242_s0 = inlined_call_operand.hbm [shape: f32[10,128], index: 0, kind: input, shape index: {}]   ;;  %s243_s1 = inlined_call_operand.hbm [shape: f32[10,128], index: 1, kind: input, shape index: {}]   ;;  %s244_s2 = inlined_call_operand.hbm [shape: f32[1,8,128], index: 2, kind: output, shape index: {}]  }
   0x1   :  { %8 = vsyncpa [#allocation6], 0 }
   0x2   :  { %9 = vsyncpa [#allocation4], 0  ;;  %s183_s9 = smov [#allocation2]   ;;  %s111_s13 = scalar_lea.hbm %s242_s0, 256 }
   0x3   :  { %s15_s10 = sshll.u32 %s183_s9, 4  ;;  %p112_p0 = scmp.ne.s32.totalorder %s242_s0, %s111_s13  ;;  %s16_s10 = int_to_ptr.vmem [resolvable:$true] %s15_s10 }
   0x4   :  { %p115_p1 = scmp.lt.u32.totalorder %s111_s13, %s242_s0 }
   0x6   :  { %p117_p2 = pnand %p115_p1, %p112_p0 }
   0x8   :  { %120 = shalt.err (!%p117_p2)
}
   0x9   :  { %s121_s18 = scalar_lea.vmem %s16_s10, 256  ;;  %p126_p4 = scmp.lt.s32.totalorder %s16_s10, %s16_s10 }
   0xa   :  { %p122_p3 = scmp.ne.s32.totalorder %s16_s10, %s121_s18  ;;  %p127_p5 = scmp.lt.s32.totalorder %s121_s18, %s121_s18 }
   0xc   :  { %p128_p6 = por %p127_p5, %p126_p4 }
   0xe   :  { %p129_p7 = pnand %p128_p6, %p122_p3 }
  0x10   :  { %132 = shalt.err (!%p129_p7)
}
  0x11   :  { %s184_s19 = smov 128   ;;  %s185_s20 = smov 8  }
  0x12   :  { %21 = dma.hbm_to_vmem [thread:$0]  %s242_s0, 256, %s16_s10, [#allocation3], %s184_s19, %s184_s19, %s185_s20  }
  0x13   :  { %s186_s23 = smov [#allocation5]   ;;  %s133_s27 = scalar_lea.hbm %s243_s1, 256 }
  0x14   :  { %s27_s24 = sshll.u32 %s186_s23, 4  ;;  %p134_p8 = scmp.ne.s32.totalorder %s243_s1, %s133_s27  ;;  %s28_s24 = int_to_ptr.vmem [resolvable:$true] %s27_s24 }
  0x15   :  { %p137_p9 = scmp.lt.u32.totalorder %s133_s27, %s243_s1 }
  0x17   :  { %p139_p10 = pnand %p137_p9, %p134_p8 }
  0x19   :  { %142 = shalt.err (!%p139_p10)
}
  0x1a   :  { %s143_s4 = scalar_lea.vmem %s28_s24, 256  ;;  %p148_p12 = scmp.lt.s32.totalorder %s28_s24, %s28_s24 }
  0x1b   :  { %p144_p11 = scmp.ne.s32.totalorder %s28_s24, %s143_s4  ;;  %p149_p13 = scmp.lt.s32.totalorder %s143_s4, %s143_s4 }
  0x1d   :  { %p150_p0 = por %p149_p13, %p148_p12 }
  0x1f   :  { %p151_p1 = pnand %p150_p0, %p144_p11 }
  0x21   :  { %154 = shalt.err (!%p151_p1)
}
  0x22   :  { %33 = dma.hbm_to_vmem [thread:$0]  %s243_s1, 256, %s28_s24, [#allocation6], %s184_s19, %s184_s19, %s185_s20  }
  0x23   :  { %177 = dma.done.wait [#allocation3], 256  }
  0x24   :  { %178 = vsyncadd [#allocation3], 4294967040 }
  0x25   :  { %179 = dma.done.wait [#allocation6], 256  }
  0x26   :  { %180 = vsyncadd [#allocation6], 4294967040  ;;  %vm44_vm0 = vcmask 1041408   ;;  %v40_v0 = vld [vmem:[#allocation2] sm:$0xff]  ;;  %v41_v1 = vld [vmem:[#allocation2 + $0x8] sm:$0x3] }
  0x27   :  { %v45_v2 = vsel %vm44_vm0, %v41_v1, -inf  ;;  %v42_v26 = vld [vmem:[#allocation5] sm:$0xff]  ;;  %v43_v27 = vld [vmem:[#allocation5 + $0x8] sm:$0x3]  ;;  %s187_s1 = smov [#allocation7]  }
  0x28   :  { %v46_v3 = vmax.f32 %v40_v0, %v45_v2  ;;  %s90_s6 = sshll.u32 %s187_s1, 4  ;;  %s91_s6 = int_to_ptr.vmem [resolvable:$true] %s90_s6 }
  0x29   :  { %s155_s7 = scalar_lea.vmem %s91_s6, 128  ;;  %p160_p3 = scmp.lt.s32.totalorder %s91_s6, %s91_s6 }
  0x2a   :  { %v47_v4 = vrot.slane %v46_v3, 4  ;;  %p156_p2 = scmp.ne.s32.totalorder %s91_s6, %s155_s7  ;;  %p161_p4 = scmp.lt.s32.totalorder %s155_s7, %s155_s7 }
  0x2c   :  { %v48_v5 = vmax.f32 %v46_v3, %v47_v4  ;;  %p162_p5 = por %p161_p4, %p160_p3 }
  0x2e   :  { %v49_v6 = vrot.slane %v48_v5, 2  ;;  %p163_p6 = pnand %p162_p5, %p156_p2 }
  0x30   :  { %v50_v7 = vmax.f32 %v48_v5, %v49_v6 }
  0x32   :  { %v51_v8 = vrot.slane %v50_v7, 1 }
  0x34   :  { %v52_v9 = vmax.f32 %v50_v7, %v51_v8 }
  0x36   :  { %v53_v10 = vsub.f32 %v40_v0, %v52_v9  ;;  %v54_v11 = vsub.f32 %v41_v1, %v52_v9 }
  0x38   :  { %v55_v12 = vmul.f32 1.442695, %v53_v10  ;;  %v57_v13 = vmul.f32 1.442695, %v54_v11 }
  0x3a   :  { %105 = vpow2.f32 %v55_v12 }
  0x3b   :  { %107 = vpow2.f32 %v57_v13 }
  0x44   :  { %v106_v14 = vpop.eup %105 }
  0x45   :  { %v108_v15 = vpop.eup %107 }
  0x46   :  { %v59_v16 = vsel %vm44_vm0, %v108_v15, 0.0 }
  0x47   :  { %v60_v17 = vadd.f32 %v106_v14, %v59_v16 }
  0x49   :  { %v61_v18 = vrot.slane %v60_v17, 4 }
  0x4b   :  { %v62_v19 = vadd.f32 %v61_v18, %v60_v17 }
  0x4d   :  { %v63_v20 = vrot.slane %v62_v19, 2 }
  0x4f   :  { %v64_v21 = vadd.f32 %v63_v20, %v62_v19 }
  0x51   :  { %v65_v22 = vrot.slane %v64_v21, 1 }
  0x53   :  { %v66_v23 = vadd.f32 %v65_v22, %v64_v21 }
  0x55   :  { %109 = vlog2.f32 %v66_v23 }
  0x5f   :  { %v110_v24 = vpop.eup %109 }
  0x60   :  { %v68_v25 = vmul.f32 0.6931472, %v110_v24 }
  0x62   :  { %v69_v28 = vsub.f32 %v68_v25, %v53_v10  ;;  %v70_v29 = vsub.f32 %v68_v25, %v54_v11 }
  0x64   :  { %v71_v30 = vmul.f32 %v69_v28, %v42_v26  ;;  %v72_v31 = vmul.f32 %v70_v29, %v43_v27 }
  0x66   :  { %v73_v32 = vsel %vm44_vm0, %v72_v31, 0.0 }
  0x67   :  { %v74_v33 = vadd.f32 %v73_v32, %v71_v30 }
  0x69   :  { %v75_v34 = vrot.slane %v74_v33, 4 }
  0x6b   :  { %v76_v35 = vadd.f32 %v75_v34, %v74_v33 }
  0x6d   :  { %v77_v36 = vrot.slane %v76_v35, 2 }
  0x6f   :  { %v78_v37 = vadd.f32 %v77_v36, %v76_v35 }
  0x71   :  { %v79_v38 = vrot.slane %v78_v37, 1 }
  0x73   :  { %v80_v39 = vadd.f32 %v79_v38, %v78_v37 }
  0x75   :  { %81 = vadd.xlane.f32.xlu0 %v80_v39 }
 0x102   :  { %v82_v40 = vpop.xlane.xlu0 %81 }
 0x103   :  { %83 = vst [vmem:[#allocation7] sm:$0xff] %v82_v40 }
 0x104   :  { %166 = shalt.err (!%p163_p6)
}
 0x105   :  { %s167_s10 = scalar_lea.hbm %s244_s2, 128 }
 0x106   :  { %p168_p7 = scmp.ne.s32.totalorder %s244_s2, %s167_s10  ;;  %p171_p8 = scmp.lt.u32.totalorder %s167_s10, %s244_s2 }
 0x108   :  { %p173_p9 = pnand %p171_p8, %p168_p7 }
 0x10a   :  { %176 = shalt.err (!%p173_p9)
}
 0x10b   :  { %93 = dma.vmem_to_hbm [thread:$0]  %s91_s6, 128, %s244_s2, [#allocation4]  }
 0x10c   :  { %181 = dma.done.wait [#allocation4], 128  }
 0x10d   :  { %182 = vsyncadd [#allocation4], 4294967168 }
 0x10e   :  { %97 = vsyncpa [#allocation3], 1 }
 0x10f   :  { %98 = vsyncpa [#allocation6], 1 }
 0x110   :  { %99 = vsyncpa [#allocation4], 1 }

</bundles_post_ra>
